<compile_context>
chip_gen: v7x
topology: tpu7x:2x2x1
jax: 0.10.0
libtpu: 0.0.40
codegen_flags: <defaults>
</compile_context>

<pallas_src>
import jax
import jax.numpy as jnp
from jax import lax
from jax.experimental import pallas as pl
from jax.experimental.pallas import tpu as pltpu

NEG_SLOPE = 0.01  # nn.LeakyReLU default

# Padded layer widths (zero padding; numerically exact vs 8->60->60->30->1).
D_IN = 8
H1 = 64    # 60 -> 64
H2 = 64    # 60 -> 64
H3 = 32    # 30 -> 32
D_OUT = 8  # 1  -> 8 (only row 0 is real)

_NN = (((1,), (0,)), ((), ()))  # standard lhs @ rhs


def _leaky_relu(x):
    # Exact for 0 < slope < 1; single mul + max (no compare/select pair).
    return jnp.maximum(x, NEG_SLOPE * x)


def deepnet_kernel(x_ref,
                   w1_ref, b1_ref,
                   w2_ref, b2_ref,
                   w3_ref, b3_ref,
                   w4_ref, b4_ref,
                   o_ref):
    cdt = w1_ref.dtype  # compute dtype (bf16 by default, f32 for exact mode)

    # x tile: (8, TILE_B), already in compute dtype and lane-dense.
    x = x_ref[...]

    # layer 1: (H1, 8) @ (8, TILE_B) -> (H1, TILE_B), f32 accumulation.
    h = lax.dot_general(w1_ref[...], x, _NN,
                        preferred_element_type=jnp.float32) + b1_ref[...]
    h = _leaky_relu(h)

    # layer 2: (H2, H1) @ (H1, TILE_B) -> (H2, TILE_B)
    h = lax.dot_general(w2_ref[...], h.astype(cdt), _NN,
                        preferred_element_type=jnp.float32) + b2_ref[...]
    h = _leaky_relu(h)

    # layer 3: (H3, H2) @ (H2, TILE_B) -> (H3, TILE_B)
    h = lax.dot_general(w3_ref[...], h.astype(cdt), _NN,
                        preferred_element_type=jnp.float32) + b3_ref[...]
    h = _leaky_relu(h)

    # output: (D_OUT, H3) @ (H3, TILE_B) -> (D_OUT, TILE_B); only row 0 is real.
    y = lax.dot_general(w4_ref[...], h.astype(cdt), _NN,
                        preferred_element_type=jnp.float32) + b4_ref[...]

    # Lane-dense (1, TILE_B) store.
    o_ref[...] = y[0:1, :].astype(o_ref.dtype)


def _round_up(n, m):
    return (n + m - 1) // m * m


def _cdiv(a, b):
    return -(-a // b)


def _pad_to(a, shape):
    pads = [(0, t - s) for s, t in zip(a.shape, shape)]
    return jnp.pad(a, pads)


def prepare_params(params, compute_dtype=jnp.bfloat16):
    """Zero-pad PyTorch-layout (out, in) weights / (out,) biases to 8/128-aligned
    shapes and cast the weights to the MXU compute dtype.  Biases stay f32
    (added after the f32-accumulated matmul).  Zero padding is exact."""
    w1 = _pad_to(params["w1"], (H1, D_IN)).astype(compute_dtype)
    w2 = _pad_to(params["w2"], (H2, H1)).astype(compute_dtype)
    w3 = _pad_to(params["w3"], (H3, H2)).astype(compute_dtype)
    w4 = _pad_to(params["w4"], (D_OUT, H3)).astype(compute_dtype)
    b1 = _pad_to(params["b1"].reshape(-1, 1), (H1, 1)).astype(jnp.float32)
    b2 = _pad_to(params["b2"].reshape(-1, 1), (H2, 1)).astype(jnp.float32)
    b3 = _pad_to(params["b3"].reshape(-1, 1), (H3, 1)).astype(jnp.float32)
    b4 = _pad_to(params["b4"].reshape(-1, 1), (D_OUT, 1)).astype(jnp.float32)
    return w1, b1, w2, b2, w3, b3, w4, b4


def _choose_tiling(B, max_tile_b):
    """Pick (num_tiles, TILE_B): even step count (>=2, so v7x's two TensorCores
    split the 'parallel' axis), tiles as large as the VMEM budget allows (each
    grid step carries ~0.35us fixed overhead), batch rounded to 128 lanes."""
    max_tile_b = max(128, _round_up(max_tile_b, 128))
    B = max(int(B), 1)
    num_tiles = max(2, _round_up(_cdiv(B, max_tile_b), 2))
    tile_b = _round_up(_cdiv(B, num_tiles), 128)
    return num_tiles, tile_b


def deepnet_forward(x, params, *, compute_dtype=jnp.bfloat16, max_tile_b=4096):
    """x: (B, 8) float32.  params: PyTorch-layout weights (out, in), biases (out,).

    Returns (B, 1), matching DeepNet.forward.  compute_dtype=jnp.float32 gives
    the exact f32 module numerics; bf16 (default) keeps f32 accumulation but
    runs the matmuls at the MXU's bf16 rate (~1e-2 tolerance vs f32).
    max_tile_b=4096 keeps the lane-dense tiles well inside even v5e's 16 MiB
    scoped-VMEM default (raise together with vmem_limit_bytes if needed)."""
    B = x.shape[0]
    w1, b1, w2, b2, w3, b3, w4, b4 = prepare_params(params, compute_dtype)

    num_tiles, tile_b = _choose_tiling(B, max_tile_b)
    b_pad = num_tiles * tile_b

    xp = jnp.pad(x, ((0, b_pad - B), (0, 0))) if b_pad != B else x
    # Batch-on-lanes: x lives as (8, B_pad) so the 128-lane axis is always full
    # and the kernel's x DMA / VMEM footprint is dense (no 8->128 lane pad).
    # The compute-dtype cast happens once here (halves the x HBM read in bf16).
    xt = jnp.asarray(xp.T, dtype=compute_dtype)

    def full(a):
        # Constant index map -> block DMA'd once and held resident in VMEM.
        return pl.BlockSpec(a.shape, lambda i: (0,) * a.ndim)

    out = pl.pallas_call(
        deepnet_kernel,
        out_shape=jax.ShapeDtypeStruct((1, b_pad), jnp.float32),
        grid=(num_tiles,),
        in_specs=[
            pl.BlockSpec((D_IN, tile_b), lambda i: (0, i)),  # lane-dense x tile
            full(w1), full(b1),
            full(w2), full(b2),
            full(w3), full(b3),
            full(w4), full(b4),
        ],
        out_specs=pl.BlockSpec((1, tile_b), lambda i: (0, i)),
        compiler_params=pltpu.CompilerParams(
            dimension_semantics=("parallel",)),  # megacore split on v7x
    )(xt, w1, b1, w2, b2, w3, b3, w4, b4)

    return out[0, :B].reshape(B, 1)


def init_params(key):
    """Deterministic init mirroring PyTorch nn.Linear defaults:
    U(-1/sqrt(fan_in), 1/sqrt(fan_in)) for both weight (out, in) and bias (out,)."""
    dims = [(8, 60), (60, 60), (60, 30), (30, 1)]  # (fan_in, fan_out)
    params = {}
    for i, (fan_in, fan_out) in enumerate(dims, start=1):
        key, kw, kb = jax.random.split(key, 3)
        bound = 1.0 / (fan_in ** 0.5)
        params[f"w{i}"] = jax.random.uniform(kw, (fan_out, fan_in), jnp.float32,
                                             -bound, bound)
        params[f"b{i}"] = jax.random.uniform(kb, (fan_out,), jnp.float32,
                                             -bound, bound)
    return params


def deepnet_reference_f32(x, params):
    """Pure f32 reference = exact PyTorch module semantics."""
    h = x
    for i in (1, 2, 3):
        h = h @ params[f"w{i}"].T + params[f"b{i}"]
        h = jnp.maximum(h, NEG_SLOPE * h)
    return h @ params["w4"].T + params["b4"]


def deepnet_reference_mixed(x, params, compute_dtype=jnp.bfloat16):
    """Mirrors the kernel numerics exactly: compute-dtype operands, f32 accum."""
    nt = (((1,), (1,)), ((), ()))  # contract last dims: h @ w.T
    h = x.astype(compute_dtype)
    for i in (1, 2, 3):
        w = params[f"w{i}"].astype(compute_dtype)
        a = lax.dot_general(h, w, nt,
                            preferred_element_type=jnp.float32) + params[f"b{i}"]
        a = jnp.maximum(a, NEG_SLOPE * a)
        h = a.astype(compute_dtype)
    w4 = params["w4"].astype(compute_dtype)
    return lax.dot_general(h, w4, nt,
                           preferred_element_type=jnp.float32) + params["b4"]


if __name__ == "__main__":
    key = jax.random.PRNGKey(0)
    kx, kp, kx2 = jax.random.split(key, 3)

    params = init_params(kp)

    # Small batch (2 grid steps of one 128-row tile each).
    B = 8
    x = jax.random.normal(kx, (B, D_IN), jnp.float32)
    out = jax.block_until_ready(deepnet_forward(x, params))
    assert out.shape == (B, 1), out.shape
    ref_mixed = deepnet_reference_mixed(x, params)
    ref_f32 = deepnet_reference_f32(x, params)
    assert jnp.allclose(out, ref_mixed, atol=2e-3, rtol=2e-3), \
        "mismatch vs bf16/f32-accum reference (B=8)"
    assert jnp.allclose(out, ref_f32, atol=5e-2, rtol=5e-2), \
        "mismatch vs f32 reference (B=8, loose bf16 tolerance)"

    # Exact-f32 path: bit-level module semantics.
    out_exact = jax.block_until_ready(
        deepnet_forward(x, params, compute_dtype=jnp.float32))
    assert jnp.allclose(out_exact, ref_f32, atol=1e-4, rtol=1e-4), \
        "mismatch vs f32 reference (exact f32 path)"

    # Multi-tile ragged batch: 2500 -> 2 grid steps of TILE_B=1280 (60 pad rows),
    # even step count so v7x's two TensorCores get balanced work.
    B2 = 2500
    x2 = jax.random.normal(kx2, (B2, D_IN), jnp.float32)
    out2 = jax.block_until_ready(deepnet_forward(x2, params))
    assert out2.shape == (B2, 1), out2.shape
    ref2 = deepnet_reference_mixed(x2, params)
    assert jnp.allclose(out2, ref2, atol=2e-3, rtol=2e-3), \
        "mismatch vs bf16/f32-accum reference (B=2500)"

    print("KERNEL_OK")
</pallas_src>

<mosaic_0001>
module attributes {stable_mosaic.version = 11 : i64} {
  func.func @deepnet_kernel(%arg0: i32, %arg1: memref<8x128xbf16, #tpu.memory_space<vmem>>, %arg2: memref<64x8xbf16, #tpu.memory_space<vmem>>, %arg3: memref<64x1xf32, #tpu.memory_space<vmem>>, %arg4: memref<64x64xbf16, #tpu.memory_space<vmem>>, %arg5: memref<64x1xf32, #tpu.memory_space<vmem>>, %arg6: memref<32x64xbf16, #tpu.memory_space<vmem>>, %arg7: memref<32x1xf32, #tpu.memory_space<vmem>>, %arg8: memref<8x32xbf16, #tpu.memory_space<vmem>>, %arg9: memref<8x1xf32, #tpu.memory_space<vmem>>, %arg10: memref<1x128xf32, #tpu.memory_space<vmem>>) attributes {dimension_semantics = [#tpu.dimension_semantics<parallel>], iteration_bounds = array<i64: 2>, scalar_prefetch = 0 : i64, scratch_operands = 0 : i64, tpu.core_type = #tpu.core_type<tc>, window_params = [{transform_indices = @transform_0, window_bounds = array<i64: 8, 128>}, {pipeline_mode = #tpu.pipeline_mode<synchronous>, transform_indices = @transform_1, window_bounds = array<i64: 64, 8>}, {pipeline_mode = #tpu.pipeline_mode<synchronous>, transform_indices = @transform_2, window_bounds = array<i64: 64, 1>}, {pipeline_mode = #tpu.pipeline_mode<synchronous>, transform_indices = @transform_3, window_bounds = array<i64: 64, 64>}, {pipeline_mode = #tpu.pipeline_mode<synchronous>, transform_indices = @transform_4, window_bounds = array<i64: 64, 1>}, {pipeline_mode = #tpu.pipeline_mode<synchronous>, transform_indices = @transform_5, window_bounds = array<i64: 32, 64>}, {pipeline_mode = #tpu.pipeline_mode<synchronous>, transform_indices = @transform_6, window_bounds = array<i64: 32, 1>}, {pipeline_mode = #tpu.pipeline_mode<synchronous>, transform_indices = @transform_7, window_bounds = array<i64: 8, 32>}, {pipeline_mode = #tpu.pipeline_mode<synchronous>, transform_indices = @transform_8, window_bounds = array<i64: 8, 1>}, {transform_indices = @transform_9, window_bounds = array<i64: 1, 128>}]} {
    %c0 = arith.constant 0 : index
    %c0_0 = arith.constant 0 : index
    %0 = vector.load %arg1[%c0, %c0_0] : memref<8x128xbf16, #tpu.memory_space<vmem>>, vector<8x128xbf16>
    %c0_1 = arith.constant 0 : index
    %c0_2 = arith.constant 0 : index
    %1 = vector.load %arg2[%c0_1, %c0_2] : memref<64x8xbf16, #tpu.memory_space<vmem>>, vector<64x8xbf16>
    %cst = arith.constant dense<0.000000e+00> : vector<64x128xf32>
    %2 = tpu.matmul %1, %0, %cst {dimension_numbers = #tpu.dot_dimension_numbers<[1], [0], [0], [1], [0, 0, 1, 1], [], []>} : vector<64x8xbf16>, vector<8x128xbf16>, vector<64x128xf32> -> vector<64x128xf32>
    %c0_3 = arith.constant 0 : index
    %c0_4 = arith.constant 0 : index
    %3 = vector.load %arg3[%c0_3, %c0_4] : memref<64x1xf32, #tpu.memory_space<vmem>>, vector<64x1xf32>
    %4 = vector.broadcast %3 : vector<64x1xf32> to vector<64x128xf32>
    %5 = arith.addf %2, %4 : vector<64x128xf32>
    %cst_5 = arith.constant 0.00999999977 : f32
    %6 = vector.broadcast %cst_5 : f32 to vector<64x128xf32>
    %7 = arith.mulf %6, %5 : vector<64x128xf32>
    %8 = arith.maximumf %5, %7 : vector<64x128xf32>
    %c0_6 = arith.constant 0 : index
    %c0_7 = arith.constant 0 : index
    %9 = vector.load %arg4[%c0_6, %c0_7] : memref<64x64xbf16, #tpu.memory_space<vmem>>, vector<64x64xbf16>
    %10 = arith.truncf %8 : vector<64x128xf32> to vector<64x128xbf16>
    %cst_8 = arith.constant dense<0.000000e+00> : vector<64x128xf32>
    %11 = tpu.matmul %9, %10, %cst_8 {dimension_numbers = #tpu.dot_dimension_numbers<[1], [0], [0], [1], [0, 0, 1, 1], [], []>} : vector<64x64xbf16>, vector<64x128xbf16>, vector<64x128xf32> -> vector<64x128xf32>
    %c0_9 = arith.constant 0 : index
    %c0_10 = arith.constant 0 : index
    %12 = vector.load %arg5[%c0_9, %c0_10] : memref<64x1xf32, #tpu.memory_space<vmem>>, vector<64x1xf32>
    %13 = vector.broadcast %12 : vector<64x1xf32> to vector<64x128xf32>
    %14 = arith.addf %11, %13 : vector<64x128xf32>
    %cst_11 = arith.constant 0.00999999977 : f32
    %15 = vector.broadcast %cst_11 : f32 to vector<64x128xf32>
    %16 = arith.mulf %15, %14 : vector<64x128xf32>
    %17 = arith.maximumf %14, %16 : vector<64x128xf32>
    %c0_12 = arith.constant 0 : index
    %c0_13 = arith.constant 0 : index
    %18 = vector.load %arg6[%c0_12, %c0_13] : memref<32x64xbf16, #tpu.memory_space<vmem>>, vector<32x64xbf16>
    %19 = arith.truncf %17 : vector<64x128xf32> to vector<64x128xbf16>
    %cst_14 = arith.constant dense<0.000000e+00> : vector<32x128xf32>
    %20 = tpu.matmul %18, %19, %cst_14 {dimension_numbers = #tpu.dot_dimension_numbers<[1], [0], [0], [1], [0, 0, 1, 1], [], []>} : vector<32x64xbf16>, vector<64x128xbf16>, vector<32x128xf32> -> vector<32x128xf32>
    %c0_15 = arith.constant 0 : index
    %c0_16 = arith.constant 0 : index
    %21 = vector.load %arg7[%c0_15, %c0_16] : memref<32x1xf32, #tpu.memory_space<vmem>>, vector<32x1xf32>
    %22 = vector.broadcast %21 : vector<32x1xf32> to vector<32x128xf32>
    %23 = arith.addf %20, %22 : vector<32x128xf32>
    %cst_17 = arith.constant 0.00999999977 : f32
    %24 = vector.broadcast %cst_17 : f32 to vector<32x128xf32>
    %25 = arith.mulf %24, %23 : vector<32x128xf32>
    %26 = arith.maximumf %23, %25 : vector<32x128xf32>
    %c0_18 = arith.constant 0 : index
    %c0_19 = arith.constant 0 : index
    %27 = vector.load %arg8[%c0_18, %c0_19] : memref<8x32xbf16, #tpu.memory_space<vmem>>, vector<8x32xbf16>
    %28 = arith.truncf %26 : vector<32x128xf32> to vector<32x128xbf16>
    %cst_20 = arith.constant dense<0.000000e+00> : vector<8x128xf32>
    %29 = tpu.matmul %27, %28, %cst_20 {dimension_numbers = #tpu.dot_dimension_numbers<[1], [0], [0], [1], [0, 0, 1, 1], [], []>} : vector<8x32xbf16>, vector<32x128xbf16>, vector<8x128xf32> -> vector<8x128xf32>
    %c0_21 = arith.constant 0 : index
    %c0_22 = arith.constant 0 : index
    %30 = vector.load %arg9[%c0_21, %c0_22] : memref<8x1xf32, #tpu.memory_space<vmem>>, vector<8x1xf32>
    %31 = vector.broadcast %30 : vector<8x1xf32> to vector<8x128xf32>
    %32 = arith.addf %29, %31 : vector<8x128xf32>
    %33 = vector.extract_strided_slice %32 {offsets = [0, 0], sizes = [1, 128], strides = [1, 1]} : vector<8x128xf32> to vector<1x128xf32>
    %c0_23 = arith.constant 0 : index
    %c0_24 = arith.constant 0 : index
    %34 = vector.load %arg10[%c0_23, %c0_24] : memref<1x128xf32, #tpu.memory_space<vmem>>, vector<1x128xf32>
    tpu.vector_store %arg10[%c0_23, %c0_24], %33 {strides = array<i32>} : memref<1x128xf32, #tpu.memory_space<vmem>>, vector<1x128xf32>,
    return
  }
  func.func @transform_0(%arg0: i32) -> (i32, i32) {
    %c0_i32 = arith.constant 0 : i32
    %c0_i32_0 = arith.constant 0 : i32
    return %c0_i32, %arg0 : i32, i32
  }
  func.func @transform_1(%arg0: i32) -> (i32, i32) {
    %c0_i32 = arith.constant 0 : i32
    %c0_i32_0 = arith.constant 0 : i32
    %c0_i32_1 = arith.constant 0 : i32
    return %c0_i32, %c0_i32_0 : i32, i32
  }
  func.func @transform_2(%arg0: i32) -> (i32, i32) {
    %c0_i32 = arith.constant 0 : i32
    %c0_i32_0 = arith.constant 0 : i32
    %c0_i32_1 = arith.constant 0 : i32
    return %c0_i32, %c0_i32_0 : i32, i32
  }
  func.func @transform_3(%arg0: i32) -> (i32, i32) {
    %c0_i32 = arith.constant 0 : i32
    %c0_i32_0 = arith.constant 0 : i32
    %c0_i32_1 = arith.constant 0 : i32
    return %c0_i32, %c0_i32_0 : i32, i32
  }
  func.func @transform_4(%arg0: i32) -> (i32, i32) {
    %c0_i32 = arith.constant 0 : i32
    %c0_i32_0 = arith.constant 0 : i32
    %c0_i32_1 = arith.constant 0 : i32
    return %c0_i32, %c0_i32_0 : i32, i32
  }
  func.func @transform_5(%arg0: i32) -> (i32, i32) {
    %c0_i32 = arith.constant 0 : i32
    %c0_i32_0 = arith.constant 0 : i32
    %c0_i32_1 = arith.constant 0 : i32
    return %c0_i32, %c0_i32_0 : i32, i32
  }
  func.func @transform_6(%arg0: i32) -> (i32, i32) {
    %c0_i32 = arith.constant 0 : i32
    %c0_i32_0 = arith.constant 0 : i32
    %c0_i32_1 = arith.constant 0 : i32
    return %c0_i32, %c0_i32_0 : i32, i32
  }
  func.func @transform_7(%arg0: i32) -> (i32, i32) {
    %c0_i32 = arith.constant 0 : i32
    %c0_i32_0 = arith.constant 0 : i32
    %c0_i32_1 = arith.constant 0 : i32
    return %c0_i32, %c0_i32_0 : i32, i32
  }
  func.func @transform_8(%arg0: i32) -> (i32, i32) {
    %c0_i32 = arith.constant 0 : i32
    %c0_i32_0 = arith.constant 0 : i32
    %c0_i32_1 = arith.constant 0 : i32
    return %c0_i32, %c0_i32_0 : i32, i32
  }
  func.func @transform_9(%arg0: i32) -> (i32, i32) {
    %c0_i32 = arith.constant 0 : i32
    %c0_i32_0 = arith.constant 0 : i32
    return %c0_i32, %arg0 : i32, i32
  }
}

</mosaic_0001>

<bundles_post_ra>
// kernel: tpu_custom_call.1
= control target key start
LH: loop header
LB: loop body
LE: loop exit
PB: predicated region body
PF: predicated region fallthrough
CT: control target
= control target key end

     0   :  { %14 = vsyncpa [#allocation3], 0  ;;  %s1380_s0 = inlined_call_operand.vmem [shape: bf16[8,256], index: 0, kind: input, shape index: {}]   ;;  %s1381_s1 = inlined_call_operand.vmem [shape: bf16[64,8], index: 1, kind: input, shape index: {}]   ;;  %s1382_s2 = inlined_call_operand.vmem [shape: f32[64,1], index: 2, kind: input, shape index: {}]   ;;  %s1383_s3 = inlined_call_operand.vmem [shape: bf16[64,64], index: 3, kind: input, shape index: {}]   ;;  %s1384_s4 = inlined_call_operand.vmem [shape: f32[64,1], index: 4, kind: input, shape index: {}]   ;;  %s1385_s5 = inlined_call_operand.vmem [shape: bf16[32,64], index: 5, kind: input, shape index: {}]   ;;  %s1386_s6 = inlined_call_operand.vmem [shape: f32[32,1], index: 6, kind: input, shape index: {}]   ;;  %s1387_s7 = inlined_call_operand.vmem [shape: bf16[8,32], index: 7, kind: input, shape index: {}]   ;;  %s1388_s8 = inlined_call_operand.vmem [shape: f32[8,1], index: 8, kind: input, shape index: {}]   ;;  %s1389_s9 = inlined_call_operand.hbm [shape: f32[1,256], index: 9, kind: output, shape index: {}]  }
   0x1   :  { %16 = vsyncpa [#allocation3 + $0x1], 0  ;;  %s1174_s30 = smov 0   ;;  %s1176_s10 = smov 0  }
   0x2   :  { %s1178_s11 = smov 0   ;;  %s1180_s12 = smov 0  }
   0x3 LB: > { %s1195_s13 = sadd.s32 4294967295, %s1118_s12   ;;  %s904_s14 = sadd.s32 4294967294, %s1118_s12   ;;  %s1118_s12 = sphi %s1180_s12, %s1395_s12   ;;  %s1114_s11 = sphi %s1178_s11, %s1394_s11   ;;  %s1110_s10 = sphi %s1176_s10, %s1393_s10   ;;  %s1106_s30 = sphi %s1174_s30, %s1392_s30  }
   0x4   : > { %s1199_s15 = sadd.s32 1, %s1118_s12   ;;  %s223_s16 = sadd.s32 1, %s1114_s11 }
   0x5   : > { %s220_s17 = ssub.s32 %s1118_s12, %s1199_s15  ;;  %p233_p0 = scmp.ne.s32.totalorder %s1114_s11, %s1110_s10 }
   0x6   : > { %p221_p1 = scmp.eq.s32.totalorder %s220_s17, 0  ;;  %p234_p2 = scmp.eq.s32.totalorder %s1195_s13, 1 }
   0x7   : > { %p239_p3 = scmp.ne.s32.totalorder %s1110_s10, %s1106_s30  ;;  %p240_p4 = scmp.eq.s32.totalorder %s904_s14, 1 }
   0x8   : > { %s1210_s18 = scalar_select %p221_p1, %s1114_s11, %s223_s16  }
   0x9   : > { %p1212_p5 = por %p234_p2, %p233_p0  ;;  %p1216_p6 = por %p240_p4, %p239_p3 }
   0xa   : > { %p907_p7 = scmp.ge.s32.totalorder %s1118_s12, 1  ;;  %p289_p8 = scmp.lt.s32.totalorder %s1118_s12, 3 }
   0xc   : > { %p290_p9 = pnand %p907_p7, %p289_p8 }
   0xd   : > { %p323_p10 = scmp.lt.s32.totalorder (!%p290_p9), %s1195_s13, 1  ;;  %v1046_v0 = vld [vmem:[%s1381_s1] sm:$0xff] (!%p290_p9)   ;;  %vm405_vm0 = vcmask (!%p290_p9), 64512   ;;  %vm418_vm1 = vcmask (!%p290_p9), 1043456   ;;  %v1120_v1 = vmov (!%p290_p9), 0   ;;  %v339_v3 = vld [vmem:[%s1382_s2 + $0x10] sm:$0xff] (!%p290_p9) }
   0xe   : > { %293 = sbr.rel (%p290_p9) target bundleno = 966 (0x3c6), region = 56  ;;  %957 = vmatprep.mubr.msk.bf16.mxu0 (!%p290_p9), %vm405_vm0, %v1046_v0  ;;  %1044 = vset.pattern.permute.xlu0 (!%p290_p9), %v1120_v1  ;;  %v337_v2 = vld [vmem:[%s1382_s2] sm:$0xff] (!%p290_p9)  ;;  %v338_v5 = vld [vmem:[%s1382_s2 + $0x8] sm:$0xff] (!%p290_p9)  ;;  %v340_v8 = vld [vmem:[%s1382_s2 + $0x18] sm:$0xff] (!%p290_p9)  ;;  %vm583_vm2 = vcmask (!%p290_p9), 523264   ;;  %vm1122_vm3 = vmmov (!%p290_p9), 0  }
   0xf   : > { %1045 = vset.pattern.permute.xlu1 (!%p290_p9), %v1120_v1  ;;  %347 = vperm.xlu0 (!%p290_p9), %1044, %v337_v2   ;;  %v1047_v7 = vld [vmem:[%s1381_s1 + $0x8] sm:$0xff] (!%p290_p9)   ;;  %v1048_v9 = vld [vmem:[%s1381_s1 + $0x10] sm:$0xff] (!%p290_p9)   ;;  %v341_v10 = vld [vmem:[%s1382_s2 + $0x20] sm:$0xff] (!%p290_p9)  ;;  %vm791_vm4 = vcmask (!%p290_p9), 261120   ;;  %s321_s14 = sand.u32 (!%p290_p9), 1, %s1110_s10   ;;  %s930_s16 = sshll.u32 (!%p290_p9), %s1195_s13, 4 }
  0x10   : > { %357 = vperm.xlu1 (!%p290_p9), %1045, %v339_v3   ;;  %v342_v11 = vld [vmem:[%s1382_s2 + $0x28] sm:$0xff] (!%p290_p9)  ;;  %v343_v12 = vld [vmem:[%s1382_s2 + $0x30] sm:$0xff] (!%p290_p9)  ;;  %v1049_v13 = vld [vmem:[%s1381_s1 + $0x18] sm:$0xff] (!%p290_p9)   ;;  %s322_s17 = scalar_lea.vmem (!%p290_p9), [#allocation2], %s321_s14  ;;  %s1338_s25 = scalar_lea.hbm (!%p290_p9), %s1389_s9, %s930_s16 }
  0x11   : > { %v344_v14 = vld [vmem:[%s1382_s2 + $0x38] sm:$0xff] (!%p290_p9)  ;;  %v515_v15 = vld [vmem:[%s1384_s4] sm:$0xff] (!%p290_p9)  ;;  %v516_v16 = vld [vmem:[%s1384_s4 + $0x8] sm:$0xff] (!%p290_p9)  ;;  %s849_s21 = sshll.u32 (!%p290_p9), %s322_s17, 4  ;;  %s1340_s21 = int_to_ptr.vmem [resolvable:$true] %s849_s21 }
  0x12   : > { %v517_v17 = vld [vmem:[%s1384_s4 + $0x10] sm:$0xff] (!%p290_p9)  ;;  %v518_v18 = vld [vmem:[%s1384_s4 + $0x18] sm:$0xff] (!%p290_p9)  ;;  %v519_v19 = vld [vmem:[%s1384_s4 + $0x20] sm:$0xff] (!%p290_p9)  ;;  %s1056_s26 = scalar_lea.vmem (!%p290_p9), %s1340_s21, 16 }
  0x13   : > { %352 = vperm.xlu0 (!%p290_p9), %1044, %v338_v5   ;;  %v520_v20 = vld [vmem:[%s1384_s4 + $0x28] sm:$0xff] (!%p290_p9)  ;;  %v521_v21 = vld [vmem:[%s1384_s4 + $0x30] sm:$0xff] (!%p290_p9)  ;;  %v522_v22 = vld [vmem:[%s1384_s4 + $0x38] sm:$0xff] (!%p290_p9)  ;;  %p1057_p11 = scmp.ne.s32.totalorder (!%p290_p9), %s1340_s21, %s1056_s26 }
  0x14   : > { %362 = vperm.xlu1 (!%p290_p9), %1045, %v340_v8   ;;  %v685_v23 = vld [vmem:[%s1386_s6] sm:$0xff] (!%p290_p9)  ;;  %v686_v24 = vld [vmem:[%s1386_s6 + $0x8] sm:$0xff] (!%p290_p9)  ;;  %v687_v25 = vld [vmem:[%s1386_s6 + $0x10] sm:$0xff] (!%p290_p9) }
  0x15   : > { %s324_s23 = scalar_select %p323_p10, %s1195_s13, 1  ;;  %v688_v26 = vld [vmem:[%s1386_s6 + $0x18] sm:$0xff]  ;;  %v785_v27 = vld [vmem:[%s1388_s8] sm:$0xff] }
  0x16   : > { %v1050_v28 = vld [vmem:[%s1383_s3] sm:$0xff]   ;;  %s837_s13 = scalar_lea.sflag [#allocation3], %s321_s14  ;;  %p1058_p12 = pnand %p1057_p11, %p1212_p5 }
  0x17   : > { %s908_s24 = sshll.u32 %s324_s23, 2  ;;  %367 = vperm.xlu0 %1044, %v341_v10   ;;  %973 = vmatprep.mubr.msk.bf16.mxu1 %vm583_vm2, %v1050_v28  ;;  %v1052_v10 = vld [vmem:[%s1383_s3 + $0x10] sm:$0xff]  }
  0x18   : > { %s326_s29 = scalar_lea.vmem %s1380_s0, %s908_s24  ;;  %372 = vperm.xlu1 %1045, %v342_v11   ;;  %v1053_v11 = vld [vmem:[%s1383_s3 + $0x18] sm:$0xff]   ;;  %p1059_p13 = pneg %p1058_p12 }
  0x19   : > { %v328_v4 = vld [vmem:[%s326_s29] sm:$0xf]  ;;  %s1123_s24 = smov [#allocation2]  }
  0x1a   : > { %1001 = vmatprep.subr.msk.bf16.mxu0 %vm418_vm1, %v328_v4  ;;  %v420_v6 = vsel %vm418_vm1, %v328_v4, 0  ;;  %s1060_s27 = sshll.u32 %s1123_s24, 4  ;;  %s1061_s27 = int_to_ptr.vmem [resolvable:$false] %s1060_s27 }
  0x1b   : > { %956 = vmatpush3.bf16.msra.mxu0 %v420_v6  ;;  %377 = vperm.xlu0 %1044, %v343_v12   ;;  %v1054_v12 = vld [vmem:[%s1385_s5] sm:$0xff]   ;;  %s1062_s28 = scalar_lea.vmem %s1061_s27, 32  ;;  %p1063_p0 = scmp.lt.s32.totalorder %s1340_s21, %s1061_s27 }
  0x1c   : > { %382 = vperm.xlu1 %1045, %v344_v14   ;;  %p1064_p1 = scmp.lt.s32.totalorder %s1062_s28, %s1056_s26 }
  0x1e   : > { %958 = vmatmul.mubr.msk.bf16.vlgmr.msra.gmra.mrb[0].mxu0 %vm405_vm0, %v1047_v7  ;;  %p1065_p2 = por %p1064_p1, %p1063_p0 }
  0x1f   : > { %961 = vmatprep.mubr.msk.bf16.mxu0 %vm405_vm0, %v1048_v9  ;;  %525 = vperm.xlu0 %1044, %v515_v15   ;;  %v1051_v9 = vld [vmem:[%s1383_s3 + $0x8] sm:$0xff]  }
  0x20   : > { %530 = vperm.xlu1 %1045, %v516_v16   ;;  %p1066_p3 = pnand %p1065_p2, %p1059_p13 }
  0x23   : > { %535 = vperm.xlu0 %1044, %v517_v17  }
  0x24   : > { %540 = vperm.xlu1 %1045, %v518_v18  }
  0x26   : > { %962 = vmatmul.mubr.msk.bf16.gmra.mrb[4].mxu0 %vm405_vm0, %v1049_v13 }
  0x27   : > { %545 = vperm.xlu0 %1044, %v519_v19   ;;  %989 = vmatprep.mubr.msk.bf16.mxu0 %vm583_vm2, %v1054_v12 }
  0x28   : > { %550 = vperm.xlu1 %1045, %v520_v20  }
  0x2b   : > { %555 = vperm.xlu0 %1044, %v521_v21  }
  0x2c   : > { %560 = vperm.xlu1 %1045, %v522_v22  }
  0x2f   : > { %691 = vperm.xlu0 %1044, %v685_v23  }
  0x30   : > { %696 = vperm.xlu1 %1045, %v686_v24  }
  0x33   : > { %701 = vperm.xlu0 %1044, %v687_v25  }
  0x34   : > { %706 = vperm.xlu1 %1045, %v688_v26  }
  0x37   : > { %788 = vperm.xlu0 %1044, %v785_v27  }
  0x8e   : > { %v348_v29 = vpop.permute.xlu0 %347 }
  0x8f   : > { %v358_v30 = vpop.permute.xlu1 %357 }
  0x92   : > { %v353_v31 = vpop.permute.xlu0 %352 }
  0x93   : > { %v363_v32 = vpop.permute.xlu1 %362 }
  0x96   : > { %v368_v36 = vpop.permute.xlu0 %367 }
  0x97   : > { %v373_v42 = vpop.permute.xlu1 %372 }
  0x9a   : > { %v378_v49 = vpop.permute.xlu0 %377 }
  0x9b   : > { %v383_v56 = vpop.permute.xlu1 %382 }
  0x9e   : > { %v526_v13 = vpop.permute.xlu0 %525 }
  0x9f   : > { %v531_v14 = vpop.permute.xlu1 %530 }
  0xa2   : > { %v536_v15 = vpop.permute.xlu0 %535 }
  0xa3   : > { %v541_v16 = vpop.permute.xlu1 %540 }
  0xa6   : > { %v546_v20 = vpop.permute.xlu0 %545 }
  0xa7   : > { %v551_v26 = vpop.permute.xlu1 %550 }
  0xf1   : > { %v959_v33 = vpop.f32.mrb[0].mxu0 }
  0xf2   : > { %v465_v34 = vadd.f32 %v959_v33, %v358_v30  ;;  %v456_v35 = vpop.f32.mrb[1].mxu0  ;;  %v556_v33 = vpop.permute.xlu0 %555 }
  0xf3   : > { %v457_v37 = vadd.f32 %v456_v35, %v348_v29  ;;  %v960_v38 = vpop.f32.mrb[2].mxu0 }
  0xf4   : > { %v489_v39 = vmul.f32 0.01, %v465_v34  ;;  %v468_v40 = vadd.f32 %v960_v38, %v363_v32  ;;  %v459_v41 = vpop.f32.mrb[3].mxu0 }
  0xf5   : > { %v487_v43 = vmul.f32 0.01, %v457_v37  ;;  %v460_v44 = vadd.f32 %v459_v41, %v353_v31 }
  0xf6   : > { %v490_v45 = vmul.f32 0.01, %v468_v40  ;;  %v497_v47 = vmax.f32 %v465_v34, %v489_v39 }
  0xf7   : > { %v488_v46 = vmul.f32 0.01, %v460_v44  ;;  %v495_v50 = vmax.f32 %v457_v37, %v487_v43 }
  0xf8   : > { %v498_v48 = vmax.f32 %v468_v40, %v490_v45  ;;  %v561_v40 = vpop.permute.xlu1 %560 }
  0xf9   : > { %v496_v51 = vmax.f32 %v460_v44, %v488_v46  ;;  %v963_v52 = vpop.f32.mrb[4].mxu0 }
  0xfa   : > { %v481_v53 = vadd.f32 %v963_v52, %v378_v49  ;;  %v472_v54 = vpop.f32.mrb[5].mxu0  ;;  %v512_v55 = vpack.c.bf16 %v498_v48, %v497_v47 }
  0xfb   : > { %v473_v57 = vadd.f32 %v472_v54, %v368_v36  ;;  %v964_v58 = vpop.f32.mrb[6].mxu0  ;;  %v511_v59 = vpack.c.bf16 %v496_v51, %v495_v50 }
  0xfc   : > { %v493_v60 = vmul.f32 0.01, %v481_v53  ;;  %v484_v61 = vadd.f32 %v964_v58, %v383_v56  ;;  %v475_v62 = vpop.f32.mrb[7].mxu0  ;;  %v1121_v58 = vmov 0.0  }
  0xfd   : > { %v491_v63 = vmul.f32 0.01, %v473_v57  ;;  %v476_v0 = vadd.f32 %v475_v62, %v373_v42  ;;  %965 = vmatprep.subr.bf16.mxu1 %v511_v59 }
  0xfe   : > { %v494_v1 = vmul.f32 0.01, %v484_v61  ;;  %966 = vmatpush3.bf16.msra.mxu1 %v511_v59  ;;  %v501_v3 = vmax.f32 %v481_v53, %v493_v60  ;;  %v692_v59 = vpop.permute.xlu0 %691  ;;  %v697_v60 = vpop.permute.xlu1 %696 }
  0xff   : > { %v492_v2 = vmul.f32 0.01, %v476_v0  ;;  %967 = vmatprep.subr.bf16.mxu1 %v512_v55  ;;  %v499_v5 = vmax.f32 %v473_v57, %v491_v63  ;;  %v1055_v57 = vld [vmem:[%s1385_s5 + $0x8] sm:$0xff]  }
 0x100   : > { %v502_v4 = vmax.f32 %v484_v61, %v494_v1 }
 0x101   : > { %v500_v6 = vmax.f32 %v476_v0, %v492_v2 }
 0x102   : > { %968 = vmatpush3.bf16.msra.mxu1 %v512_v55  ;;  %v514_v7 = vpack.c.bf16 %v502_v4, %v501_v3  ;;  %v702_v61 = vpop.permute.xlu0 %701  ;;  %v707_v1 = vpop.permute.xlu1 %706 }
 0x103   : > { %v513_v8 = vpack.c.bf16 %v500_v6, %v499_v5 }
 0x105   : > { %969 = vmatprep.subr.bf16.mxu1 %v513_v8 }
 0x106   : > { %970 = vmatpush3.bf16.msra.mxu1 %v513_v8 }
 0x107   : > { %971 = vmatprep.subr.bf16.mxu1 %v514_v7 }
 0x10a   : > { %972 = vmatpush3.bf16.msra.mxu1 %v514_v7 }
 0x10d   : > { %974 = vmatmul.mubr.msk.bf16.vlgmr.msra.gmra.mrb[0].mxu1 %vm583_vm2, %v1051_v9 }
 0x10e   : > { %977 = vmatprep.mubr.msk.bf16.mxu1 %vm583_vm2, %v1052_v10 }
 0x115   : > { %978 = vmatmul.mubr.msk.bf16.gmra.mrb[4].mxu1 %vm583_vm2, %v1053_v11 }
 0x1e0   : > { %v975_v17 = vpop.f32.mrb[0].mxu1 }
 0x1e1   : > { %v639_v18 = vadd.f32 %v975_v17, %v536_v15  ;;  %v630_v19 = vpop.f32.mrb[1].mxu1  ;;  %v782_v17 = vld [vmem:[%s1387_s7] sm:$0xf] }
 0x1e2   : > { %v631_v21 = vadd.f32 %v630_v19, %v526_v13  ;;  %v976_v22 = vpop.f32.mrb[2].mxu1 }
 0x1e3   : > { %v663_v23 = vmul.f32 0.01, %v639_v18  ;;  %v642_v24 = vadd.f32 %v976_v22, %v541_v16  ;;  %v633_v25 = vpop.f32.mrb[3].mxu1 }
 0x1e4   : > { %v661_v27 = vmul.f32 0.01, %v631_v21  ;;  %v634_v28 = vadd.f32 %v633_v25, %v531_v14 }
 0x1e5   : > { %v664_v29 = vmul.f32 0.01, %v642_v24  ;;  %v671_v31 = vmax.f32 %v639_v18, %v663_v23  ;;  %v789_v18 = vpop.permute.xlu0 %788 }
 0x1e6   : > { %v662_v30 = vmul.f32 0.01, %v634_v28  ;;  %v669_v34 = vmax.f32 %v631_v21, %v661_v27 }
 0x1e7   : > { %v672_v32 = vmax.f32 %v642_v24, %v664_v29 }
 0x1e8   : > { %v670_v35 = vmax.f32 %v634_v28, %v662_v30  ;;  %v979_v36 = vpop.f32.mrb[4].mxu1 }
 0x1e9   : > { %v655_v37 = vadd.f32 %v979_v36, %v556_v33  ;;  %v646_v38 = vpop.f32.mrb[5].mxu1  ;;  %v682_v39 = vpack.c.bf16 %v672_v32, %v671_v31 }
 0x1ea   : > { %v647_v41 = vadd.f32 %v646_v38, %v546_v20  ;;  %v980_v42 = vpop.f32.mrb[6].mxu1  ;;  %v681_v43 = vpack.c.bf16 %v670_v35, %v669_v34 }
 0x1eb   : > { %v667_v44 = vmul.f32 0.01, %v655_v37  ;;  %v658_v45 = vadd.f32 %v980_v42, %v561_v40  ;;  %v649_v46 = vpop.f32.mrb[7].mxu1 }
 0x1ec   : > { %v665_v47 = vmul.f32 0.01, %v647_v41  ;;  %v650_v48 = vadd.f32 %v649_v46, %v551_v26  ;;  %981 = vmatprep.subr.bf16.mxu0 %v681_v43 }
 0x1ed   : > { %v668_v49 = vmul.f32 0.01, %v658_v45  ;;  %982 = vmatpush3.bf16.msra.mxu0 %v681_v43  ;;  %v675_v51 = vmax.f32 %v655_v37, %v667_v44 }
 0x1ee   : > { %v666_v50 = vmul.f32 0.01, %v650_v48  ;;  %983 = vmatprep.subr.bf16.mxu0 %v682_v39  ;;  %v673_v53 = vmax.f32 %v647_v41, %v665_v47 }
 0x1ef   : > { %v676_v52 = vmax.f32 %v658_v45, %v668_v49 }
 0x1f0   : > { %v674_v54 = vmax.f32 %v650_v48, %v666_v50 }
 0x1f1   : > { %984 = vmatpush3.bf16.msra.mxu0 %v682_v39  ;;  %v684_v55 = vpack.c.bf16 %v676_v52, %v675_v51 }
 0x1f2   : > { %v683_v56 = vpack.c.bf16 %v674_v54, %v673_v53 }
 0x1f4   : > { %985 = vmatprep.subr.bf16.mxu0 %v683_v56 }
 0x1f5   : > { %986 = vmatpush3.bf16.msra.mxu0 %v683_v56 }
 0x1f6   : > { %987 = vmatprep.subr.bf16.mxu0 %v684_v55 }
 0x1f9   : > { %988 = vmatpush3.bf16.msra.mxu0 %v684_v55 }
 0x1fa   : > { %993 = vmatprep.subr.bf16.mxu0 %v1121_v58 }
 0x1fc   : > { %990 = vmatmul.mubr.msk.bf16.vlgmr.msra.gmra.mrb[8].mxu0 %vm583_vm2, %v1055_v57 }
 0x1fd   : > { %997 = vmatprep.mubr.msk.bf16.mxu0 %vm1122_vm3, %v1121_v58 }
 0x2cf   : > { %v991_v62 = vpop.f32.mrb[8].mxu0 }
 0x2d0   : > { %v768_v63 = vadd.f32 %v991_v62, %v702_v61  ;;  %v759_v0 = vpop.f32.mrb[9].mxu0 }
 0x2d1   : > { %v760_v2 = vadd.f32 %v759_v0, %v692_v59  ;;  %v992_v3 = vpop.f32.mrb[10].mxu0 }
 0x2d2   : > { %v776_v4 = vmul.f32 0.01, %v768_v63  ;;  %v771_v5 = vadd.f32 %v992_v3, %v707_v1  ;;  %v762_v6 = vpop.f32.mrb[11].mxu0 }
 0x2d3   : > { %v774_v7 = vmul.f32 0.01, %v760_v2  ;;  %v763_v8 = vadd.f32 %v762_v6, %v697_v60 }
 0x2d4   : > { %v777_v9 = vmul.f32 0.01, %v771_v5  ;;  %v780_v11 = vmax.f32 %v768_v63, %v776_v4 }
 0x2d5   : > { %v775_v10 = vmul.f32 0.01, %v763_v8  ;;  %v778_v13 = vmax.f32 %v760_v2, %v774_v7 }
 0x2d6   : > { %v781_v12 = vmax.f32 %v771_v5, %v777_v9 }
 0x2d7   : > { %v779_v14 = vmax.f32 %v763_v8, %v775_v10 }
 0x2d8   : > { %v784_v15 = vpack.c.bf16 %v781_v12, %v780_v11 }
 0x2d9   : > { %v783_v16 = vpack.c.bf16 %v779_v14, %v778_v13 }
 0x2db   : > { %994 = vmatpush3.bf16.msra.mxu0 %v783_v16 }
 0x2dc   : > { %995 = vmatprep.subr.bf16.mxu0 %v1121_v58 }
 0x2df   : > { %996 = vmatpush3.bf16.msra.mxu0 %v784_v15 }
 0x2e2   : > { %998 = vmatmul.mubr.msk.bf16.vlgmr.msra.gmra.mrb[12].mxu0 %vm791_vm4, %v782_v17 }
 0x3b5   : > { %v829_v19 = vpop.f32.mrb[12].mxu0 }
 0x3b6   : > { %v830_v20 = vadd.f32 %v829_v19, %v789_v18  ;;  %v999_v21 = vpop.f32.mrb[13].mxu0 }
 0x3b7   : > { %v832_v22 = vpop.f32.mrb[14].mxu0 }
 0x3b8   : > { %835 = vst [vmem:[%s322_s17] sm:$0x1] %v830_v20  ;;  %v1000_v23 = vpop.f32.mrb[15].mxu0 }
 0x3b9   : > { %1069 = shalt.err (!%p1066_p3)
}
 0x3ba   : > { %s1070_s29 = scalar_lea.hbm %s1338_s25, 16  ;;  %s1074_s17 = scalar_lea.hbm %s1389_s9, 32 }
 0x3bb   : > { %p1071_p4 = scmp.ne.s32.totalorder %s1338_s25, %s1070_s29  ;;  %p1075_p9 = scmp.lt.u32.totalorder %s1338_s25, %s1389_s9 }
 0x3bc   : > { %p1076_p10 = scmp.lt.u32.totalorder %s1074_s17, %s1070_s29  ;;  %p1078_p12 = scmp.lt.u32.totalorder %s1070_s29, %s1338_s25 }
 0x3bd   : > { %p1072_p7 = pnand %p1071_p4, %p1212_p5 }
 0x3be   : > { %p1077_p11 = por %p1076_p10, %p1075_p9 }
 0x3bf   : > { %p1073_p8 = pneg %p1072_p7 }
 0x3c0   : > { %p1079_p13 = por %p1078_p12, %p1077_p11 }
 0x3c2   : > { %p1080_p0 = pnand %p1079_p13, %p1073_p8 }
 0x3c4   : > { %1083 = shalt.err (!%p1080_p0)
}
 0x3c5   : > { %1002 = dma.vmem_to_hbm [thread:$0]  (%p1212_p5), %s1340_s21, 16, %s1338_s25, %s837_s13  }
 0x3c6 PF: > { %p1008_p1 = scmp.ge.s32.totalorder %s1118_s12, 2  ;;  %s861_s26 = sand.u32 1, %s1106_s30  }
 0x3c7   : > { %s862_s24 = scalar_lea.sflag [#allocation3], %s861_s26 }
 0x3c8   : > { %p1005_p2 = pnand %p1008_p1, %p1216_p6 }
 0x3ca   : > { %1101 = dma.done.wait (!%p1005_p2), %s862_s24, 16  }
 0x3cb   : > { %1103 = vsyncadd (!%p1005_p2), %s862_s24, 4294967280  ;;  %p19_p3 = scmp.ge.s32.totalorder %s1199_s15, 4   ;;  %s1392_s30 = smov %s1110_s10 }
 0x3cc   : > { %s1393_s10 = smov %s1114_s11  ;;  %s1394_s11 = smov %s1210_s18 }
 0x3cd   : > { %s1395_s12 = smov %s1199_s15  ;;  %21 = sbr.rel (!%p19_p3) target bundleno = 3 (0x3), region = 91 }
 0x3d4   :  { %866 = vsyncpa [#allocation3], 1 }
 0x3d5   :  { %868 = vsyncpa [#allocation3 + $0x1], 1 }

</bundles_post_ra>
